<compile_context>
chip_gen: v5e
topology: v5e:2x2
jax: 0.10.0
libtpu: 0.0.40
codegen_flags: <defaults>
</compile_context>

<pallas_src>
import functools

import numpy as np
import jax
import jax.numpy as jnp
from jax import lax
from jax.experimental import pallas as pl
from jax.experimental.pallas import tpu as pltpu


_FILTER_TAPS = {
    1: [1.0],
    2: [1.0, 1.0],
    3: [1.0, 2.0, 1.0],
    4: [1.0, 3.0, 3.0, 1.0],
    5: [1.0, 4.0, 6.0, 4.0, 1.0],
    6: [1.0, 5.0, 10.0, 10.0, 5.0, 1.0],
    7: [1.0, 6.0, 15.0, 20.0, 15.0, 6.0, 1.0],
}


def _round_up(x, m):
    return ((x + m - 1) // m) * m


def _sublane_pack(dtype):
    return {4: 8, 2: 16, 1: 32}.get(jnp.dtype(dtype).itemsize, 8)


@functools.lru_cache(maxsize=1)
def _chip_config():
    """Returns (hbm_bytes_per_s, peak_bf16_flops, vmem_budget, vmem_limit)."""
    vmem_cap = 64 * 1024 * 1024                     # conservative (v7x-sized) default
    try:
        vmem_cap = int(pltpu.get_tpu_info().vmem_capacity_bytes)
    except Exception:
        pass
    kind = ""
    try:
        kind = jax.devices()[0].device_kind.lower()
    except Exception:
        pass
    if "v6" in kind:                                # v6e
        hbm_bw, peak = 1.35e12, 918e12
    elif "v5 lite" in kind or "v5e" in kind or "v5lite" in kind:
        hbm_bw, peak = 0.82e12, 197e12
    elif "v5" in kind:                              # v5p
        hbm_bw, peak = 2.7e12, 459e12
    elif "7" in kind:                               # v7x
        hbm_bw, peak = 3.2e12, 996e12
    elif "v4" in kind:
        hbm_bw, peak = 1.2e12, 275e12
    else:                                           # unknown: low ridge -> prefer separable sooner
        hbm_bw, peak = 1.0e12, 400e12
    # Working-set budget ~40% of physical VMEM (headroom for compiler scratch
    # and temporaries); scoped limit ~75%, capped at 96 MiB.
    budget = min(int(0.40 * vmem_cap), 56 * 1024 * 1024)
    limit = min(int(0.75 * vmem_cap), 96 * 1024 * 1024)
    return hbm_bw, peak, budget, limit


@functools.lru_cache(maxsize=None)
def _tap_matrix(n_in, filt_size, stride, pad_before, pad_after, pad_type):
    """(n_out, n_in) float64 matrix encoding pad + 1-D blur taps + stride."""
    a = np.asarray(_FILTER_TAPS[filt_size], dtype=np.float64)
    a_n = a / a.sum()  # outer(a_n, a_n) == filt / filt.sum()
    n_pad = n_in + pad_before + pad_after
    n_out = (n_pad - filt_size) // stride + 1
    m = np.zeros((n_out, n_in), dtype=np.float64)
    for i in range(n_out):
        for d in range(filt_size):
            p = stride * i + d - pad_before  # index into the *unpadded* axis
            if 0 <= p <= n_in - 1:
                q = p
            elif pad_type in ("refl", "reflect"):
                q = -p if p < 0 else 2 * (n_in - 1) - p
                if not (0 <= q <= n_in - 1):
                    raise ValueError(
                        f"reflect padding larger than input dim ({n_in}) is not supported")
            elif pad_type in ("repl", "replicate"):
                q = min(max(p, 0), n_in - 1)
            elif pad_type == "zero":
                continue  # zero padding contributes nothing
            else:
                raise ValueError(f"pad type [{pad_type}] not recognized")
            m[i, q] += a_n[d]
    return m, n_out


def _downsample_kron(x, bh64, bw64, Ho, Wo, allow_fallback=True, max_cb=None):
    """Small/medium-spatial fast path: pad+blur+stride on both axes folded into
    one lane-dense MXU matmul per (N*C)-folded channel block."""
    N, C, H, W = x.shape
    NC, HW, HoWo = N * C, H * W, Ho * Wo
    Kout = _round_up(HoWo, 128)                 # lane-dense (unmasked) output stores
    dtype = x.dtype
    itemsize = jnp.dtype(dtype).itemsize
    pack = _sublane_pack(dtype)
    _, _, budget, vmem_limit = _chip_config()

    # VMEM working set: double-buffered x/out blocks + resident constant matrix
    # (conservatively counted twice) + the f32 matmul result.
    fixed = 2 * HW * Kout * itemsize
    per_cb = 2 * (HW + Kout) * itemsize + Kout * 4
    avail = budget - fixed
    cb = int(avail // per_cb) if avail > 0 else 0
    if max_cb is not None:
        cb = min(cb, max_cb)
    if cb >= NC:
        cb = NC
    elif cb >= pack:
        cb = (cb // pack) * pack
        # Even out the grid so the last block isn't a sliver (helps v7x's 2 cores).
        cb = _round_up(pl.cdiv(NC, pl.cdiv(NC, cb)), pack)
    elif NC <= pack:
        cb = NC
    else:
        cb = 0
    if cb <= 0:
        if allow_fallback:          # constant matrix too large for VMEM -> two-stage path
            return _downsample_separable(x, bh64, bw64, Ho, Wo, max_cb=max_cb)
        cb = min(NC, pack)          # forced kron: accept going over the soft budget

    # M[oh*Wo+ow, h*W+w] = Bh[oh,h]*Bw[ow,w]; out_flat = x_flat @ M (cols zero-padded).
    m_np = np.kron(bh64, bw64).T.astype(np.float32)            # (H*W, Ho*Wo)
    if Kout != HoWo:
        m_np = np.pad(m_np, ((0, 0), (0, Kout - HoWo)))
    m = jnp.asarray(m_np, dtype=dtype)
    x_flat = x.reshape(NC, HW)                                  # free (contiguous dims)

    def kernel(x_ref, m_ref, o_ref):
        # x_ref: (cb, H*W), m_ref: (H*W, Kout), o_ref: (cb, Kout); all lane-dense.
        o_ref[...] = jnp.dot(
            x_ref[...], m_ref[...], preferred_element_type=jnp.float32
        ).astype(o_ref.dtype)

    flops = int(2 * NC * HW * Kout)
    bytes_accessed = int((NC * HW + NC * Kout + HW * Kout) * itemsize)

    out = pl.pallas_call(
        kernel,
        out_shape=jax.ShapeDtypeStruct((NC, Kout), dtype),
        grid=(pl.cdiv(NC, cb),),
        in_specs=[
            pl.BlockSpec((cb, HW), lambda i: (i, 0)),
            pl.BlockSpec((HW, Kout), lambda i: (0, 0)),
        ],
        out_specs=pl.BlockSpec((cb, Kout), lambda i: (i, 0)),
        compiler_params=pltpu.CompilerParams(
            dimension_semantics=("parallel",),
            vmem_limit_bytes=vmem_limit),
        cost_estimate=pl.CostEstimate(
            flops=flops, transcendentals=0, bytes_accessed=bytes_accessed),
    )(x_flat, m)
    if Kout != HoWo:
        out = out[:, :HoWo]                      # drop the lane-padding columns
    return out.reshape(N, C, Ho, Wo)             # free (contiguous dims)


def _downsample_separable(x, bh64, bw64, Ho, Wo, max_cb=None):
    """General / large-spatial path: fused W-side matmul + channel-batched
    H-side matmul over (N*C)-folded channel blocks."""
    N, C, H, W = x.shape
    NC = N * C
    dtype = x.dtype
    itemsize = jnp.dtype(dtype).itemsize
    pack = _sublane_pack(dtype)
    _, _, budget, vmem_limit = _chip_config()

    # VMEM per block: double-buffered x/out blocks, the (cb, Ho, H) Bh and
    # (W, Wo) BwT constants (counted double-buffered), plus f32 intermediates.
    fixed = 2 * W * Wo * itemsize
    per_cb = (2 * (H * W + Ho * Wo) + 2 * Ho * H) * itemsize + (H * Wo + Ho * Wo) * 4
    avail = budget - fixed
    cb = int(avail // per_cb) if avail > per_cb else 1
    cb = max(1, min(cb, 256, NC))                # 256 caps the batched-matmul unroll
    if max_cb is not None:
        cb = max(1, min(cb, max_cb))
    if cb < NC:
        cb = pl.cdiv(NC, pl.cdiv(NC, cb))        # even out the grid blocks
        if cb > pack:
            cb = _round_up(cb, pack)

    bh_f32 = bh64.astype(np.float32)                                   # (Ho, H)
    # Host-side broadcast of Bh over the channel block so the H-side contraction
    # is a plain batched matmul (no per-step broadcast).  See module TODO about
    # the single-matmul (channel-packed) alternative.
    bh_b = jnp.asarray(np.tile(bh_f32[None], (cb, 1, 1)), dtype=dtype)  # (cb, Ho, H)
    bwT = jnp.asarray(bw64.T.astype(np.float32), dtype=dtype)           # (W, Wo)
    x3 = x.reshape(NC, H, W)                                            # free (contiguous)

    def kernel(x_ref, bh_ref, bwT_ref, o_ref):
        xb = x_ref[...]                                        # (cb, H, W), input dtype
        # W-side blur+stride: one fused MXU matmul over all channels' rows.
        t = jnp.dot(xb.reshape(cb * H, W), bwT_ref[...],
                    preferred_element_type=jnp.float32)        # (cb*H, Wo), f32 accum
        t = t.astype(xb.dtype).reshape(cb, H, Wo)
        # H-side blur+stride: channel-batched matmul (c is the batch dim).
        y = jnp.einsum("coh,chw->cow", bh_ref[...], t,
                       preferred_element_type=jnp.float32)     # (cb, Ho, Wo)
        o_ref[...] = y.astype(o_ref.dtype)

    flops = int(2 * NC * (H * W * Wo + Ho * H * Wo))
    bytes_accessed = int((NC * (H * W + Ho * Wo) + cb * Ho * H + W * Wo) * itemsize)

    out = pl.pallas_call(
        kernel,
        out_shape=jax.ShapeDtypeStruct((NC, Ho, Wo), dtype),
        grid=(pl.cdiv(NC, cb),),
        in_specs=[
            pl.BlockSpec((cb, H, W), lambda i: (i, 0, 0)),
            pl.BlockSpec((cb, Ho, H), lambda i: (0, 0, 0)),
            pl.BlockSpec((W, Wo), lambda i: (0, 0)),
        ],
        out_specs=pl.BlockSpec((cb, Ho, Wo), lambda i: (i, 0, 0)),
        compiler_params=pltpu.CompilerParams(
            dimension_semantics=("parallel",),
            vmem_limit_bytes=vmem_limit),
        cost_estimate=pl.CostEstimate(
            flops=flops, transcendentals=0, bytes_accessed=bytes_accessed),
    )(x3, bh_b, bwT)
    return out.reshape(N, C, Ho, Wo)                           # free (contiguous dims)


def make_downsample(channels, pad_type="reflect", filt_size=3, stride=2, pad_off=0,
                    impl="auto", block_channels=None):
    """Returns a callable reproducing Downsample.forward for NCHW inputs.

    impl: "auto" (roofline + VMEM based choice), "kron" (force the fused
          single-matmul path), or "separable" (force the two-stage path).
    block_channels: optional cap on folded channels per grid block (testing knob).
    """
    pad_before = int(1.0 * (filt_size - 1) / 2) + pad_off
    pad_after = int(np.ceil(1.0 * (filt_size - 1) / 2)) + pad_off

    def apply(x):
        N, C, H, W = x.shape
        assert C == channels, "channel mismatch with module config"
        if filt_size == 1 and pad_off == 0:
            return x[:, :, ::stride, ::stride]

        bh64, Ho = _tap_matrix(H, filt_size, stride, pad_before, pad_after, pad_type)
        bw64, Wo = _tap_matrix(W, filt_size, stride, pad_before, pad_after, pad_type)

        if impl == "separable":
            return _downsample_separable(x, bh64, bw64, Ho, Wo, max_cb=block_channels)
        if impl == "kron":
            return _downsample_kron(x, bh64, bw64, Ho, Wo,
                                    allow_fallback=False, max_cb=block_channels)

        # "auto": fused kron matmul only while it stays HBM-bound on this
        # generation / dtype and its constant matrix fits the VMEM budget.
        hbm_bw, peak_bf16, budget, _ = _chip_config()
        itemsize = jnp.dtype(x.dtype).itemsize
        peak = peak_bf16 * (1.0 if itemsize <= 2 else 0.5)      # f32 MXU derate
        NC, HW = N * C, H * W
        Kout = _round_up(Ho * Wo, 128)
        pack = min(_sublane_pack(x.dtype), NC)
        kron_flops = 2.0 * NC * HW * Kout
        kron_bytes = float(NC * (HW + Kout) + HW * Kout) * itemsize
        kron_mem_bound = kron_flops / peak <= kron_bytes / hbm_bw
        kron_fits = (2 * HW * Kout * itemsize
                     + pack * (2 * (HW + Kout) * itemsize + Kout * 4)) <= budget
        if kron_mem_bound and kron_fits:
            return _downsample_kron(x, bh64, bw64, Ho, Wo, max_cb=block_channels)
        return _downsample_separable(x, bh64, bw64, Ho, Wo, max_cb=block_channels)

    return apply


def reference_downsample(x, channels, pad_type="reflect", filt_size=3, stride=2, pad_off=0):
    """Pure-JAX reference mirroring the PyTorch forward (pad -> depthwise conv)."""
    pad_before = int(1.0 * (filt_size - 1) / 2) + pad_off
    pad_after = int(np.ceil(1.0 * (filt_size - 1) / 2)) + pad_off
    if filt_size == 1 and pad_off == 0:
        return x[:, :, ::stride, ::stride]
    mode = {"refl": "reflect", "reflect": "reflect",
            "repl": "edge", "replicate": "edge", "zero": "constant"}[pad_type]
    xp = jnp.pad(x, ((0, 0), (0, 0), (pad_before, pad_after), (pad_before, pad_after)),
                 mode=mode)
    a = np.asarray(_FILTER_TAPS[filt_size], dtype=np.float64)
    f2 = np.outer(a, a)
    f2 = (f2 / f2.sum()).astype(np.float32)
    w = jnp.tile(jnp.asarray(f2)[None, None], (channels, 1, 1, 1))   # (C, 1, fs, fs)
    return lax.conv_general_dilated(
        xp, w, window_strides=(stride, stride), padding="VALID",
        dimension_numbers=("NCHW", "OIHW", "NCHW"), feature_group_count=channels)


if __name__ == "__main__":
    key0, key1 = jax.random.split(jax.random.PRNGKey(0))
    x = jax.random.normal(key0, (2, 4, 16, 16), dtype=jnp.float32)

    # f32, auto -> kron (lane-dense single-matmul) path at this spatial size.
    y = jax.block_until_ready(make_downsample(channels=4)(x))
    assert y.shape == (2, 4, 8, 8) and y.dtype == x.dtype
    y_ref = reference_downsample(x, channels=4)
    np.testing.assert_allclose(np.asarray(y), np.asarray(y_ref), rtol=1e-5, atol=1e-5)

    # f32, force the separable (large-spatial) path on the same input.
    y_sep = jax.block_until_ready(make_downsample(channels=4, impl="separable")(x))
    np.testing.assert_allclose(np.asarray(y_sep), np.asarray(y_ref), rtol=1e-5, atol=1e-5)

    # Different pad type / filter size through the separable path.
    y5 = jax.block_until_ready(
        make_downsample(channels=4, pad_type="replicate", filt_size=5,
                        impl="separable")(x))
    y5_ref = reference_downsample(x, channels=4, pad_type="replicate", filt_size=5)
    np.testing.assert_allclose(np.asarray(y5), np.asarray(y5_ref), rtol=1e-5, atol=1e-5)

    # Multi-block grid with a partial last block (N*C = 12 split into blocks of 8).
    x2 = jax.random.normal(key1, (3, 4, 16, 16), dtype=jnp.float32)
    y2_ref = reference_downsample(x2, channels=4)
    y2_k = jax.block_until_ready(
        make_downsample(channels=4, impl="kron", block_channels=8)(x2))
    np.testing.assert_allclose(np.asarray(y2_k), np.asarray(y2_ref), rtol=1e-5, atol=1e-5)
    y2_s = jax.block_until_ready(
        make_downsample(channels=4, impl="separable", block_channels=8)(x2))
    np.testing.assert_allclose(np.asarray(y2_s), np.asarray(y2_ref), rtol=1e-5, atol=1e-5)

    # bf16 activations: operands stay bf16 on the MXU, accumulation in f32.
    xb = x.astype(jnp.bfloat16)
    yb = jax.block_until_ready(make_downsample(channels=4)(xb))
    assert yb.shape == (2, 4, 8, 8) and yb.dtype == jnp.bfloat16
    yb_ref = reference_downsample(xb.astype(jnp.float32), channels=4)
    np.testing.assert_allclose(np.asarray(yb, dtype=np.float32), np.asarray(yb_ref),
                               rtol=5e-2, atol=5e-2)

    print("KERNEL_OK")
</pallas_src>

<mosaic_0001>
module attributes {stable_mosaic.version = 11 : i64} {
  func.func @kernel(%arg0: i32, %arg1: memref<8x256xf32, #tpu.memory_space<vmem>>, %arg2: memref<256x128xf32, #tpu.memory_space<vmem>>, %arg3: memref<8x128xf32, #tpu.memory_space<vmem>>) attributes {dimension_semantics = [#tpu.dimension_semantics<parallel>], iteration_bounds = array<i64: 1>, scalar_prefetch = 0 : i64, scratch_operands = 0 : i64, tpu.core_type = #tpu.core_type<tc>, window_params = [{transform_indices = @transform_0, window_bounds = array<i64: 8, 256>}, {pipeline_mode = #tpu.pipeline_mode<synchronous>, transform_indices = @transform_1, window_bounds = array<i64: 256, 128>}, {transform_indices = @transform_2, window_bounds = array<i64: 8, 128>}]} {
    %c0 = arith.constant 0 : index
    %c0_0 = arith.constant 0 : index
    %0 = vector.load %arg1[%c0, %c0_0] : memref<8x256xf32, #tpu.memory_space<vmem>>, vector<8x256xf32>
    %c0_1 = arith.constant 0 : index
    %c0_2 = arith.constant 0 : index
    %1 = vector.load %arg2[%c0_1, %c0_2] : memref<256x128xf32, #tpu.memory_space<vmem>>, vector<256x128xf32>
    %cst = arith.constant dense<0.000000e+00> : vector<8x128xf32>
    %2 = tpu.matmul %0, %1, %cst {dimension_numbers = #tpu.dot_dimension_numbers<[1], [0], [0], [1], [0, 0, 1, 1], [], []>} : vector<8x256xf32>, vector<256x128xf32>, vector<8x128xf32> -> vector<8x128xf32>
    %c0_3 = arith.constant 0 : index
    %c0_4 = arith.constant 0 : index
    %3 = vector.load %arg3[%c0_3, %c0_4] : memref<8x128xf32, #tpu.memory_space<vmem>>, vector<8x128xf32>
    tpu.vector_store %arg3[%c0_3, %c0_4], %2 {strides = array<i32>} : memref<8x128xf32, #tpu.memory_space<vmem>>, vector<8x128xf32>,
    return
  }
  func.func @transform_0(%arg0: i32) -> (i32, i32) {
    %c0_i32 = arith.constant 0 : i32
    %c0_i32_0 = arith.constant 0 : i32
    return %arg0, %c0_i32 : i32, i32
  }
  func.func @transform_1(%arg0: i32) -> (i32, i32) {
    %c0_i32 = arith.constant 0 : i32
    %c0_i32_0 = arith.constant 0 : i32
    %c0_i32_1 = arith.constant 0 : i32
    return %c0_i32, %c0_i32_0 : i32, i32
  }
  func.func @transform_2(%arg0: i32) -> (i32, i32) {
    %c0_i32 = arith.constant 0 : i32
    %c0_i32_0 = arith.constant 0 : i32
    return %arg0, %c0_i32 : i32, i32
  }
}

</mosaic_0001>

<bundles_post_ra>
// kernel: tpu_custom_call.1
= control target key start
LH: loop header
LB: loop body
LE: loop exit
PB: predicated region body
PF: predicated region fallthrough
CT: control target
= control target key end

     0   :  { %7 = vsyncpa [#allocation3], 0  ;;  %s247_s0 = inlined_call_operand.hbm [shape: f32[8,256], index: 0, kind: input, shape index: {}]   ;;  %s248_s1 = inlined_call_operand.hbm [shape: f32[256,128], index: 1, kind: input, shape index: {}]   ;;  %s249_s2 = inlined_call_operand.hbm [shape: f32[8,128], index: 2, kind: output, shape index: {}]  }
   0x1   :  { %8 = vsyncpa [#allocation6], 0 }
   0x2   :  { %9 = vsyncpa [#allocation4], 0  ;;  %s15_s11 = sshll.u32 %s247_s0, 4  ;;  %s218_s12 = smov [#allocation2]   ;;  %s16_s11 = int_to_ptr.hbm [resolvable:$true] %s15_s11 }
   0x3   :  { %s17_s13 = sshll.u32 %s218_s12, 4  ;;  %s25_s16 = sshll.u32 %s248_s1, 4  ;;  %s18_s13 = int_to_ptr.vmem [resolvable:$true] %s17_s13  ;;  %s26_s16 = int_to_ptr.hbm [resolvable:$true] %s25_s16 }
   0x4   :  { %20 = dma.hbm_to_vmem [thread:$0]  %s16_s11, 256, %s18_s13, [#allocation3]  }
   0x5   :  { %s219_s17 = smov [#allocation5]   ;;  %s220_s19 = smov 128  }
   0x6   :  { %s27_s18 = sshll.u32 %s219_s17, 4  ;;  %s221_s20 = smov 8   ;;  %s28_s18 = int_to_ptr.vmem [resolvable:$true] %s27_s18 }
   0x7   :  { %33 = dma.hbm_to_vmem [thread:$0]  %s26_s16, 4096, %s28_s18, [#allocation6], %s220_s19, %s220_s19, %s221_s20  }
   0x8   :  { %212 = dma.done.wait [#allocation3], 256  }
   0x9   :  { %213 = vsyncadd [#allocation3], 4294967040 }
   0xa   :  { %214 = dma.done.wait [#allocation6], 4096  }
   0xb   :  { %215 = vsyncadd [#allocation6], 4294963200  ;;  %v59_v0 = vld [vmem:[#allocation5 + $0x78] sm:$0xff]  ;;  %v58_v2 = vld [vmem:[#allocation5 + $0x70] sm:$0xff]  ;;  %s222_s0 = smov [#allocation7]   ;;  %s124_s23 = sshll.u32 %s249_s2, 4  ;;  %s125_s23 = int_to_ptr.hbm [resolvable:$true] %s124_s23 }
   0xc   :  { %v75_v1 = vld [vmem:[#allocation5 + $0xf8] sm:$0xff]  ;;  %76 = vmatpush.msra.mxu0 %v59_v0  ;;  %v74_v3 = vld [vmem:[#allocation5 + $0xf0] sm:$0xff]  ;;  %v57_v4 = vld [vmem:[#allocation5 + $0x68] sm:$0xff]  ;;  %s122_s1 = sshll.u32 %s222_s0, 4  ;;  %s123_s1 = int_to_ptr.vmem [resolvable:$true] %s122_s1 }
   0xd   :  { %96 = vmatpush.msra.mxu1 %v75_v1  ;;  %v73_v5 = vld [vmem:[#allocation5 + $0xe8] sm:$0xff]  ;;  %v56_v6 = vld [vmem:[#allocation5 + $0x60] sm:$0xff]  ;;  %v55_v8 = vld [vmem:[#allocation5 + $0x58] sm:$0xff] }
   0xe   :  { %77 = vmatpush.msra.mxu0 %v58_v2  ;;  %v72_v7 = vld [vmem:[#allocation5 + $0xe0] sm:$0xff]  ;;  %v71_v9 = vld [vmem:[#allocation5 + $0xd8] sm:$0xff]  ;;  %v54_v10 = vld [vmem:[#allocation5 + $0x50] sm:$0xff] }
   0xf   :  { %97 = vmatpush.msra.mxu1 %v74_v3  ;;  %v70_v11 = vld [vmem:[#allocation5 + $0xd0] sm:$0xff]  ;;  %v53_v12 = vld [vmem:[#allocation5 + $0x48] sm:$0xff]  ;;  %v52_v14 = vld [vmem:[#allocation5 + $0x40] sm:$0xff] }
  0x10   :  { %78 = vmatpush.msra.mxu0 %v57_v4  ;;  %v69_v13 = vld [vmem:[#allocation5 + $0xc8] sm:$0xff]  ;;  %v68_v15 = vld [vmem:[#allocation5 + $0xc0] sm:$0xff]  ;;  %v51_v16 = vld [vmem:[#allocation5 + $0x38] sm:$0xff] }
  0x11   :  { %98 = vmatpush.msra.mxu1 %v73_v5  ;;  %v67_v17 = vld [vmem:[#allocation5 + $0xb8] sm:$0xff]  ;;  %v50_v18 = vld [vmem:[#allocation5 + $0x30] sm:$0xff]  ;;  %v49_v20 = vld [vmem:[#allocation5 + $0x28] sm:$0xff] }
  0x12   :  { %79 = vmatpush.msra.mxu0 %v56_v6  ;;  %v66_v19 = vld [vmem:[#allocation5 + $0xb0] sm:$0xff]  ;;  %v65_v21 = vld [vmem:[#allocation5 + $0xa8] sm:$0xff]  ;;  %v48_v22 = vld [vmem:[#allocation5 + $0x20] sm:$0xff] }
  0x13   :  { %99 = vmatpush.msra.mxu1 %v72_v7  ;;  %v64_v23 = vld [vmem:[#allocation5 + $0xa0] sm:$0xff]  ;;  %v47_v24 = vld [vmem:[#allocation5 + $0x18] sm:$0xff]  ;;  %v46_v26 = vld [vmem:[#allocation5 + $0x10] sm:$0xff] }
  0x14   :  { %80 = vmatpush.msra.mxu0 %v55_v8  ;;  %v63_v25 = vld [vmem:[#allocation5 + $0x98] sm:$0xff]  ;;  %v62_v27 = vld [vmem:[#allocation5 + $0x90] sm:$0xff]  ;;  %v45_v28 = vld [vmem:[#allocation5 + $0x8] sm:$0xff] }
  0x15   :  { %100 = vmatpush.msra.mxu1 %v71_v9  ;;  %v61_v29 = vld [vmem:[#allocation5 + $0x88] sm:$0xff]  ;;  %v44_v30 = vld [vmem:[#allocation5] sm:$0xff]  ;;  %v42_v32 = vld [vmem:[#allocation2] sm:$0xff] }
  0x16   :  { %81 = vmatpush.msra.mxu0 %v54_v10  ;;  %v60_v31 = vld [vmem:[#allocation5 + $0x80] sm:$0xff]  ;;  %v43_v33 = vld [vmem:[#allocation2 + $0x8] sm:$0xff] }
  0x17   :  { %101 = vmatpush.msra.mxu1 %v70_v11 }
  0x18   :  { %82 = vmatpush.msra.mxu0 %v53_v12 }
  0x19   :  { %102 = vmatpush.msra.mxu1 %v69_v13 }
  0x1a   :  { %83 = vmatpush.msra.mxu0 %v52_v14 }
  0x1b   :  { %103 = vmatpush.msra.mxu1 %v68_v15 }
  0x1c   :  { %84 = vmatpush.msra.mxu0 %v51_v16 }
  0x1d   :  { %104 = vmatpush.msra.mxu1 %v67_v17 }
  0x1e   :  { %85 = vmatpush.msra.mxu0 %v50_v18 }
  0x1f   :  { %105 = vmatpush.msra.mxu1 %v66_v19 }
  0x20   :  { %86 = vmatpush.msra.mxu0 %v49_v20 }
  0x21   :  { %106 = vmatpush.msra.mxu1 %v65_v21 }
  0x22   :  { %87 = vmatpush.msra.mxu0 %v48_v22 }
  0x23   :  { %107 = vmatpush.msra.mxu1 %v64_v23 }
  0x24   :  { %88 = vmatpush.msra.mxu0 %v47_v24 }
  0x25   :  { %108 = vmatpush.msra.mxu1 %v63_v25 }
  0x26   :  { %89 = vmatpush.msra.mxu0 %v46_v26 }
  0x27   :  { %109 = vmatpush.msra.mxu1 %v62_v27 }
  0x28   :  { %90 = vmatpush.msra.mxu0 %v45_v28 }
  0x29   :  { %110 = vmatpush.msra.mxu1 %v61_v29 }
  0x2a   :  { %91 = vmatpush.msra.mxu0 %v44_v30 }
  0x2b   :  { %111 = vmatpush.msra.mxu1 %v60_v31  ;;  %92 = vmatmul.f32.vlgmr.msra.gmra.mxu0 %v42_v32 }
  0x2c   :  { %112 = vmatmul.f32.vlgmr.msra.gmra.mxu1 %v43_v33 }
  0xa8   :  { %v93_v34 = vpop.f32.mrf.mxu0 }
  0xa9   :  { %v113_v35 = vpop.f32.mrf.mxu1 }
  0xaa   :  { %v114_v36 = vadd.f32 %v113_v35, %v93_v34 }
  0xac   :  { %116 = vst [vmem:[#allocation7] sm:$0xff] %v114_v36 }
  0xad   :  { %127 = dma.vmem_to_hbm [thread:$0]  %s123_s1, 128, %s125_s23, [#allocation4]  }
  0xae   :  { %216 = dma.done.wait [#allocation4], 128  }
  0xaf   :  { %217 = vsyncadd [#allocation4], 4294967168 }
  0xb0   :  { %132 = vsyncpa [#allocation3], 1 }
  0xb1   :  { %133 = vsyncpa [#allocation6], 1 }
  0xb2   :  { %134 = vsyncpa [#allocation4], 1 }

</bundles_post_ra>
